<compile_context>
chip_gen: v5e
topology: v5e:2x2
jax: 0.10.0
libtpu: 0.0.40
codegen_flags: <defaults>
</compile_context>

<pallas_src>
import functools

import jax
import jax.numpy as jnp
import numpy as np
from jax import lax
from jax.experimental import pallas as pl
from jax.experimental.pallas import tpu as pltpu


def _simulation_kernel(num_steps, tt_ref, state_ref, state_out_ref):
    """state (D, 2N) lane-dense; tt = T^T (2N, 2N). One MXU matmul per step."""
    Tt = tt_ref[...]                              # (2N, 2N) one-step operator (transposed)

    def step(_, s):
        # pos' , vel' = T @ [pos; vel]  ==  s @ T^T  in the (D, 2N) layout.
        return jnp.dot(s, Tt, preferred_element_type=jnp.float32)

    unroll = max(1, min(int(num_steps), 8))       # serial loop: bounded unroll only
    state_out_ref[...] = lax.fori_loop(0, num_steps, step, state_ref[...],
                                       unroll=unroll)


def simulation_forward(nodes_position, nodes_velocity, B, L, inv_mass,
                       *, dt, stiffness, damping, num_steps):
    """Equivalent of Simulation.forward: runs num_steps of step() inside one kernel."""
    N, D = nodes_position.shape
    f32 = jnp.float32

    # ---- Build the fused one-step transition matrix (static scene data). ----
    A = (stiffness * (B.T @ (L @ B))).astype(f32)          # (N, N) spring pull-back
    C = (damping * (B.T @ B)).astype(f32)                  # (N, N) damping pull-back
    dm = (dt * inv_mass).reshape(N, 1).astype(f32)         # dt / m  per node (column)
    DA = dm * A                                            # diag(dt/m) @ A
    DC = dm * C                                            # diag(dt/m) @ C
    I = jnp.eye(N, dtype=f32)
    top = jnp.concatenate([I + dt * DA, dt * (I - DC)], axis=1)   # pos' row block
    bot = jnp.concatenate([DA, I - DC], axis=1)                   # vel' row block
    T = jnp.concatenate([top, bot], axis=0)                       # (2N, 2N)
    Tt = T.T.astype(f32)                                          # right-mul form

    # Lane-dense state slab: (D, 2N), columns 0..N-1 = pos, N..2N-1 = vel.
    state0 = jnp.concatenate(
        [nodes_position.astype(f32), nodes_velocity.astype(f32)], axis=0).T   # (D, 2N)

    kernel = functools.partial(_simulation_kernel, int(num_steps))
    vspec = pl.BlockSpec(memory_space=pltpu.MemorySpace.VMEM)
    # Tiny shapes: everything fully VMEM-resident, no grid / pipelining overhead.
    state_out = pl.pallas_call(
        kernel,
        out_shape=jax.ShapeDtypeStruct((D, 2 * N), f32),
        in_specs=[vspec, vspec],
        out_specs=vspec,
        input_output_aliases={1: 0},     # state slab updated in place
    )(Tt, state0)

    return state_out[:, :N].T, state_out[:, N:].T


def _reference_forward(nodes_position, nodes_velocity, B, L, inv_mass,
                       *, dt, stiffness, damping, num_steps):
    pos, vel = nodes_position, nodes_velocity
    for _ in range(num_steps):
        holes_pos = B @ pos
        holes_vel = B @ vel
        holes_force = stiffness * (L @ holes_pos) - damping * holes_vel
        nodes_force = B.T @ holes_force
        vel = vel + dt * nodes_force * inv_mass
        pos = pos + dt * vel
    return pos, vel


if __name__ == "__main__":
    N, H, D = 64, 16, 3            # nodes, cable holes, xyz
    NUM_STEPS = 4                  # properties.num_steps_per_segment
    DT = 0.01                      # properties.dt
    STIFFNESS = 50.0               # cable stiffness
    DAMPING = 0.5                  # cable damping

    key = jax.random.PRNGKey(0)
    k_pos, k_vel, k_w = jax.random.split(key, 3)
    nodes_position = jax.random.normal(k_pos, (N, D), dtype=jnp.float32)
    nodes_velocity = 0.1 * jax.random.normal(k_vel, (N, D), dtype=jnp.float32)

    # BarycentricListFactory: each hole is a convex combination of 4 consecutive nodes.
    w = jax.random.uniform(k_w, (H, 4), jnp.float32, minval=0.1, maxval=1.0)
    w = w / jnp.sum(w, axis=1, keepdims=True)
    B_np = np.zeros((H, N), dtype=np.float32)
    w_np = np.asarray(w)
    for h in range(H):
        start = (h * 4) % (N - 4)
        B_np[h, start:start + 4] = w_np[h]
    B = jnp.asarray(B_np)

    # Per-cable graph Laplacian: 2 cables x 8 holes, tridiagonal within each cable.
    holes_per_cable = 8
    L_np = np.zeros((H, H), dtype=np.float32)
    for c in range(H // holes_per_cable):
        off = c * holes_per_cable
        for i in range(holes_per_cable):
            deg = 0.0
            if i > 0:
                L_np[off + i, off + i - 1] = 1.0
                deg += 1.0
            if i < holes_per_cable - 1:
                L_np[off + i, off + i + 1] = 1.0
                deg += 1.0
            L_np[off + i, off + i] = -deg
    L = jnp.asarray(L_np)

    # Lumped node masses (from scene.model), stored as inverse mass column.
    inv_mass = (1.0 / jnp.linspace(1.0, 2.0, N, dtype=jnp.float32))[:, None]

    sim = jax.jit(functools.partial(simulation_forward,
                                    dt=DT, stiffness=STIFFNESS,
                                    damping=DAMPING, num_steps=NUM_STEPS))
    pos_out, vel_out = sim(nodes_position, nodes_velocity, B, L, inv_mass)
    jax.block_until_ready((pos_out, vel_out))

    ref_pos, ref_vel = _reference_forward(
        np.asarray(nodes_position), np.asarray(nodes_velocity),
        np.asarray(B), np.asarray(L), np.asarray(inv_mass),
        dt=DT, stiffness=STIFFNESS, damping=DAMPING, num_steps=NUM_STEPS)
    # Fused one-step operator reassociates float math vs. the chained reference.
    np.testing.assert_allclose(np.asarray(pos_out), ref_pos, rtol=2e-4, atol=1e-4)
    np.testing.assert_allclose(np.asarray(vel_out), ref_vel, rtol=2e-4, atol=1e-4)

    # TODO(synk): torch.utils.checkpoint (grad remat) and torch.cuda.mem_get_info bookkeeping
    # have no forward-pass effect and are intentionally omitted.
    print("KERNEL_OK")
</pallas_src>

<mosaic_0001>
module attributes {stable_mosaic.version = 11 : i64} {
  func.func @_simulation_kernel(%arg0: memref<128x128xf32, #tpu.memory_space<vmem>>, %arg1: memref<3x128xf32, #tpu.memory_space<vmem>>, %arg2: memref<3x128xf32, #tpu.memory_space<vmem>>) attributes {dimension_semantics = [], scalar_prefetch = 0 : i64, scratch_operands = 0 : i64, tpu.core_type = #tpu.core_type<tc>} {
    %c0 = arith.constant 0 : index
    %c0_0 = arith.constant 0 : index
    %0 = vector.load %arg0[%c0, %c0_0] : memref<128x128xf32, #tpu.memory_space<vmem>>, vector<128x128xf32>
    %c0_1 = arith.constant 0 : index
    %c0_2 = arith.constant 0 : index
    %1 = vector.load %arg1[%c0_1, %c0_2] : memref<3x128xf32, #tpu.memory_space<vmem>>, vector<3x128xf32>
    %c0_i32 = arith.constant 0 : i32
    %cst = arith.constant dense<0.000000e+00> : vector<3x128xf32>
    %2 = tpu.matmul %1, %0, %cst {dimension_numbers = #tpu.dot_dimension_numbers<[1], [0], [0], [1], [0, 0, 1, 1], [], []>} : vector<3x128xf32>, vector<128x128xf32>, vector<3x128xf32> -> vector<3x128xf32>
    %c1_i32 = arith.constant 1 : i32
    %cst_3 = arith.constant dense<0.000000e+00> : vector<3x128xf32>
    %3 = tpu.matmul %2, %0, %cst_3 {dimension_numbers = #tpu.dot_dimension_numbers<[1], [0], [0], [1], [0, 0, 1, 1], [], []>} : vector<3x128xf32>, vector<128x128xf32>, vector<3x128xf32> -> vector<3x128xf32>
    %c2_i32 = arith.constant 2 : i32
    %cst_4 = arith.constant dense<0.000000e+00> : vector<3x128xf32>
    %4 = tpu.matmul %3, %0, %cst_4 {dimension_numbers = #tpu.dot_dimension_numbers<[1], [0], [0], [1], [0, 0, 1, 1], [], []>} : vector<3x128xf32>, vector<128x128xf32>, vector<3x128xf32> -> vector<3x128xf32>
    %c3_i32 = arith.constant 3 : i32
    %cst_5 = arith.constant dense<0.000000e+00> : vector<3x128xf32>
    %5 = tpu.matmul %4, %0, %cst_5 {dimension_numbers = #tpu.dot_dimension_numbers<[1], [0], [0], [1], [0, 0, 1, 1], [], []>} : vector<3x128xf32>, vector<128x128xf32>, vector<3x128xf32> -> vector<3x128xf32>
    %c0_6 = arith.constant 0 : index
    %c0_7 = arith.constant 0 : index
    %6 = vector.load %arg2[%c0_6, %c0_7] : memref<3x128xf32, #tpu.memory_space<vmem>>, vector<3x128xf32>
    tpu.vector_store %arg2[%c0_6, %c0_7], %5 {strides = array<i32>} : memref<3x128xf32, #tpu.memory_space<vmem>>, vector<3x128xf32>,
    return
  }
}

</mosaic_0001>

<bundles_post_ra>
// kernel: simulation_forward.1
= control target key start
LH: loop header
LB: loop body
LE: loop exit
PB: predicated region body
PF: predicated region fallthrough
CT: control target
= control target key end

     0   :  { %s182_s0 = inlined_call_operand.vmem [shape: f32[128,128], index: 0, kind: input, shape index: {}]   ;;  %s183_s1 = inlined_call_operand.vmem [shape: f32[3,128], index: 1, kind: input, shape index: {}, may-alias: {1,2}]   ;;  %s184_s2 = inlined_call_operand.vmem [shape: f32[3,128], index: 2, kind: output, shape index: {}, may-alias: {1,2}]  }
   0x1   :  { %v26_v0 = vld [vmem:[%s182_s0 + $0x78] sm:$0xff]  ;;  %v25_v1 = vld [vmem:[%s182_s0 + $0x70] sm:$0xff]  ;;  %v24_v2 = vld [vmem:[%s182_s0 + $0x68] sm:$0xff] }
   0x2   :  { %28 = vmatpush.msra.mxu0 %v26_v0  ;;  %48 = vmatpush.msra.mxu1 %v26_v0  ;;  %v23_v3 = vld [vmem:[%s182_s0 + $0x60] sm:$0xff]  ;;  %v22_v4 = vld [vmem:[%s182_s0 + $0x58] sm:$0xff]  ;;  %v21_v5 = vld [vmem:[%s182_s0 + $0x50] sm:$0xff] }
   0x3   :  { %68 = vmatpush.msra.mxu2 %v26_v0  ;;  %88 = vmatpush.msra.mxu3 %v26_v0  ;;  %v20_v6 = vld [vmem:[%s182_s0 + $0x48] sm:$0xff]  ;;  %v19_v7 = vld [vmem:[%s182_s0 + $0x40] sm:$0xff]  ;;  %v18_v8 = vld [vmem:[%s182_s0 + $0x38] sm:$0xff] }
   0x4   :  { %29 = vmatpush.msra.mxu0 %v25_v1  ;;  %49 = vmatpush.msra.mxu1 %v25_v1  ;;  %v17_v9 = vld [vmem:[%s182_s0 + $0x30] sm:$0xff]  ;;  %v16_v10 = vld [vmem:[%s182_s0 + $0x28] sm:$0xff]  ;;  %v15_v11 = vld [vmem:[%s182_s0 + $0x20] sm:$0xff] }
   0x5   :  { %69 = vmatpush.msra.mxu2 %v25_v1  ;;  %89 = vmatpush.msra.mxu3 %v25_v1  ;;  %v14_v12 = vld [vmem:[%s182_s0 + $0x18] sm:$0xff]  ;;  %v13_v13 = vld [vmem:[%s182_s0 + $0x10] sm:$0xff]  ;;  %v12_v14 = vld [vmem:[%s182_s0 + $0x8] sm:$0xff] }
   0x6   :  { %30 = vmatpush.msra.mxu0 %v24_v2  ;;  %50 = vmatpush.msra.mxu1 %v24_v2  ;;  %v11_v15 = vld [vmem:[%s182_s0] sm:$0xff] }
   0x7   :  { %70 = vmatpush.msra.mxu2 %v24_v2  ;;  %90 = vmatpush.msra.mxu3 %v24_v2  ;;  %v27_v16 = vld [vmem:[%s183_s1] sm:$0x7] }
   0x8   :  { %31 = vmatpush.msra.mxu0 %v23_v3  ;;  %51 = vmatpush.msra.mxu1 %v23_v3 }
   0x9   :  { %71 = vmatpush.msra.mxu2 %v23_v3  ;;  %91 = vmatpush.msra.mxu3 %v23_v3 }
   0xa   :  { %32 = vmatpush.msra.mxu0 %v22_v4  ;;  %52 = vmatpush.msra.mxu1 %v22_v4 }
   0xb   :  { %72 = vmatpush.msra.mxu2 %v22_v4  ;;  %92 = vmatpush.msra.mxu3 %v22_v4 }
   0xc   :  { %33 = vmatpush.msra.mxu0 %v21_v5  ;;  %53 = vmatpush.msra.mxu1 %v21_v5 }
   0xd   :  { %73 = vmatpush.msra.mxu2 %v21_v5  ;;  %93 = vmatpush.msra.mxu3 %v21_v5 }
   0xe   :  { %34 = vmatpush.msra.mxu0 %v20_v6  ;;  %54 = vmatpush.msra.mxu1 %v20_v6 }
   0xf   :  { %74 = vmatpush.msra.mxu2 %v20_v6  ;;  %94 = vmatpush.msra.mxu3 %v20_v6 }
  0x10   :  { %35 = vmatpush.msra.mxu0 %v19_v7  ;;  %55 = vmatpush.msra.mxu1 %v19_v7 }
  0x11   :  { %75 = vmatpush.msra.mxu2 %v19_v7  ;;  %95 = vmatpush.msra.mxu3 %v19_v7 }
  0x12   :  { %36 = vmatpush.msra.mxu0 %v18_v8  ;;  %56 = vmatpush.msra.mxu1 %v18_v8 }
  0x13   :  { %76 = vmatpush.msra.mxu2 %v18_v8  ;;  %96 = vmatpush.msra.mxu3 %v18_v8 }
  0x14   :  { %37 = vmatpush.msra.mxu0 %v17_v9  ;;  %57 = vmatpush.msra.mxu1 %v17_v9 }
  0x15   :  { %77 = vmatpush.msra.mxu2 %v17_v9  ;;  %97 = vmatpush.msra.mxu3 %v17_v9 }
  0x16   :  { %38 = vmatpush.msra.mxu0 %v16_v10  ;;  %58 = vmatpush.msra.mxu1 %v16_v10 }
  0x17   :  { %78 = vmatpush.msra.mxu2 %v16_v10  ;;  %98 = vmatpush.msra.mxu3 %v16_v10 }
  0x18   :  { %39 = vmatpush.msra.mxu0 %v15_v11  ;;  %59 = vmatpush.msra.mxu1 %v15_v11 }
  0x19   :  { %79 = vmatpush.msra.mxu2 %v15_v11  ;;  %99 = vmatpush.msra.mxu3 %v15_v11 }
  0x1a   :  { %40 = vmatpush.msra.mxu0 %v14_v12  ;;  %60 = vmatpush.msra.mxu1 %v14_v12 }
  0x1b   :  { %80 = vmatpush.msra.mxu2 %v14_v12  ;;  %100 = vmatpush.msra.mxu3 %v14_v12 }
  0x1c   :  { %41 = vmatpush.msra.mxu0 %v13_v13  ;;  %61 = vmatpush.msra.mxu1 %v13_v13 }
  0x1d   :  { %81 = vmatpush.msra.mxu2 %v13_v13  ;;  %101 = vmatpush.msra.mxu3 %v13_v13 }
  0x1e   :  { %42 = vmatpush.msra.mxu0 %v12_v14  ;;  %62 = vmatpush.msra.mxu1 %v12_v14 }
  0x1f   :  { %82 = vmatpush.msra.mxu2 %v12_v14  ;;  %102 = vmatpush.msra.mxu3 %v12_v14 }
  0x20   :  { %43 = vmatpush.msra.mxu0 %v11_v15  ;;  %63 = vmatpush.msra.mxu1 %v11_v15 }
  0x21   :  { %44 = vmatmul.f32.vlgmr.msra.gmra.mxu0 %v27_v16  ;;  %83 = vmatpush.msra.mxu2 %v11_v15 }
  0x22   :  { %103 = vmatpush.msra.mxu3 %v11_v15 }
  0x9e   :  { %v45_v17 = vpop.f32.mrf.mxu0 }
  0x9f   :  { %64 = vmatmul.f32.vlgmr.msra.gmra.mxu1 %v45_v17 }
 0x11c   :  { %v65_v18 = vpop.f32.mrf.mxu1 }
 0x11d   :  { %84 = vmatmul.f32.vlgmr.msra.gmra.mxu2 %v65_v18 }
 0x1a0   :  { %v85_v19 = vpop.f32.mrf.mxu2 }
 0x1a1   :  { %104 = vmatmul.f32.vlgmr.msra.gmra.mxu3 %v85_v19 }
 0x224   :  { %v105_v20 = vpop.f32.mrf.mxu3 }
 0x225   :  { %108 = vst [vmem:[%s184_s2] sm:$0x7] %v105_v20 }

</bundles_post_ra>
